<compile_context>
chip_gen: v6e
topology: v6e:2x2x1
jax: 0.10.0
libtpu: 0.0.40
codegen_flags: <defaults>
</compile_context>

<pallas_src>
import functools

import jax
import jax.numpy as jnp
from jax import lax
from jax.experimental import pallas as pl
from jax.experimental.pallas import tpu as pltpu

# Focal-loss alpha vector from the original module (19 property classes).
_PROP_ALPHA = (0.759, 0.68, 0.9458, 0.9436, 0.9616, 0.915, 0.9618, 0.871,
               0.8724, 0.994, 0.986, 0.994, 0.9986, 0.993, 0.991, 0.9968,
               0.9986, 0.999, 0.9996)

_OUT_LANES = 128          # one lane-dense output block per core
_VMEM_TILE_BUDGET = 24 << 20
_VMEM_LIMIT_BYTES = 48 << 20
_HARD_TILE_CAP = 4096


def _ce_rows(logits, tgt_f, valid):
    """Per-row cross entropy. logits (TB,C) f32, tgt_f (TB,1) f32 class index."""
    if valid is not None:
        logits = jnp.where(valid, logits, 0.0)        # keep padded rows finite
    m = jnp.max(logits, axis=-1, keepdims=True)
    lse = m + jnp.log(jnp.sum(jnp.exp(logits - m), axis=-1, keepdims=True))
    cls = lax.broadcasted_iota(jnp.int32, logits.shape, 1)
    tgt = tgt_f.astype(jnp.int32)                     # exact for class indices
    true_logit = jnp.sum(jnp.where(cls == tgt, logits, 0.0),
                         axis=-1, keepdims=True)
    return lse - true_logit                           # (TB, 1)


def _focal_rows(p, labels, alpha, valid):
    """Multi-label focal loss (gamma=2). p/labels (TB,P), alpha (1,P)."""
    if valid is not None:
        p = jnp.where(valid, p, 0.5)                  # finite on padded rows
        labels = jnp.where(valid, labels, 0.0)
    pt = (labels - (1.0 - p)) * (2.0 * labels - 1.0)
    alpha_t = (labels - (1.0 - alpha)) * (2.0 * labels - 1.0)
    one_minus_pt = 1.0 - pt
    # NOTE: matches the PyTorch module exactly; log(pt) can blow up if the
    # caller feeds probabilities that saturate at exactly 0/1 (same as torch).
    return -alpha_t * (one_minus_pt * one_minus_pt) * jnp.log(pt)   # (TB, P)


def _muti_task_loss_kernel(ans_pred_ref, prop_pred_ref, prop_true_ref,
                           ent_pred_ref, side_ref, alpha_ref, w_ref,
                           out_ref, acc_ref,
                           *, total_b, tile_b, tiles_per_core, needs_mask):
    c = pl.program_id(0)          # core-parallel axis
    t = pl.program_id(1)          # serial reduction axis (batch tiles)

    @pl.when(t == 0)
    def _():
        acc_ref[...] = jnp.zeros_like(acc_ref)

    side = side_ref[...].astype(jnp.float32)          # (TB, 3): ans, ent, eff
    eff = side[:, 2:3]

    if needs_mask:
        tile_idx = c * tiles_per_core + t             # logical (unclamped) tile
        row = tile_idx * tile_b + lax.broadcasted_iota(jnp.int32, (tile_b, 1), 0)
        valid = row < total_b
        eff = jnp.where(valid, eff, 0.0)              # padded rows contribute 0
    else:
        valid = None

    wv = w_ref[...].astype(jnp.float32)               # (1, 3) softmaxed weights
    w0 = wv[:, 0:1]
    w1 = wv[:, 1:2]
    w2 = wv[:, 2:3]

    # ---- loss1: cross entropy over answer logits ----
    ce1 = _ce_rows(ans_pred_ref[...].astype(jnp.float32), side[:, 0:1], valid)
    # ---- loss3: cross entropy over entity logits ----
    ce3 = _ce_rows(ent_pred_ref[...].astype(jnp.float32), side[:, 1:2], valid)
    # ---- loss2: multi-label focal loss over property probabilities ----
    fl = _focal_rows(prop_pred_ref[...].astype(jnp.float32),
                     prop_true_ref[...].astype(jnp.float32),
                     alpha_ref[...].astype(jnp.float32), valid)
    fl_row = jnp.sum(fl, axis=-1, keepdims=True)      # (TB, 1)

    # Single weighted per-row total -> single scalar accumulator.
    row_total = w0 * ce1 + w1 * fl_row + w2 * ce3     # (TB, 1)
    acc_ref[...] += jnp.sum(row_total * eff, axis=0, keepdims=True)

    @pl.when(t == tiles_per_core - 1)
    def _():
        out_ref[...] = jnp.broadcast_to(acc_ref[...], (1, _OUT_LANES))


def _lane_pad(c):
    return ((c + 127) // 128) * 128


def _pick_batch_tile(b, per_row_bytes, max_tile_rows=None):
    """Biggest tile that fits the VMEM budget; multiple of 32 unless full-B."""
    cap = min(_HARD_TILE_CAP, max(32, _VMEM_TILE_BUDGET // max(per_row_bytes, 1)))
    if max_tile_rows is not None:
        cap = min(cap, max_tile_rows)
    if b <= cap:
        return b                       # block == full dim is always legal
    tb = cap - (cap % 32)              # native (16/32,128) tiling friendly
    return max(tb, 32)


def muti_task_loss(ans_true, ans_pred, prop_true, prop_pred,
                   entity_true, entity_pred, efficiency=None,
                   loss_weight=None, max_tile_rows=None):
    """Forward of MutiTaskLoss. efficiency=None reproduces use_efficiency=False."""
    b, c_ans = ans_pred.shape
    _, n_prop = prop_pred.shape
    _, c_ent = entity_pred.shape
    assert n_prop == len(_PROP_ALPHA), "prop_pred width must match alpha list"

    had_efficiency = efficiency is not None
    if efficiency is None:
        # mean-reduction CE / size_average focal == efficiency of all ones
        efficiency = jnp.ones((b,), jnp.float32)
    if loss_weight is None:
        loss_weight = jnp.ones((3,), jnp.float32)     # module init: torch.ones(3)

    # Pack the three per-row sidecars into one (B, 3) f32 array (one DMA,
    # no lane-sparse (B,1) tiles). Class indices are exact in f32.
    sidecar = jnp.stack([ans_true.astype(jnp.float32),
                         entity_true.astype(jnp.float32),
                         efficiency.astype(jnp.float32)], axis=1)    # (B, 3)

    alpha2 = jnp.asarray(_PROP_ALPHA, jnp.float32).reshape(1, n_prop)
    # softmax over the 3 learned loss weights (3 scalars -> wrapper-side)
    w = jax.nn.softmax(loss_weight.astype(jnp.float32)).reshape(1, 3)

    # Tile size from a VMEM budget (double-buffered, lane-padded footprint).
    per_row_bytes = 2 * (_lane_pad(c_ans) * ans_pred.dtype.itemsize
                         + _lane_pad(n_prop) * prop_pred.dtype.itemsize
                         + _lane_pad(n_prop) * prop_true.dtype.itemsize
                         + _lane_pad(c_ent) * entity_pred.dtype.itemsize
                         + _lane_pad(3) * 4)
    tb = _pick_batch_tile(b, per_row_bytes, max_tile_rows)
    n_tiles_total = pl.cdiv(b, tb)

    # Core-parallel split (helps v7x's 2 TCs; sequential/no-op on v5e/v6e).
    num_cores = 2 if n_tiles_total >= 2 else 1
    tiles_per_core = pl.cdiv(n_tiles_total, num_cores)
    needs_mask = (num_cores * tiles_per_core * tb) != b

    def row_map(c, t):
        # Clamp so redundant tiles (over-coverage) never index out of range;
        # their rows are zeroed by the validity mask anyway.
        return (jnp.minimum(c * tiles_per_core + t, n_tiles_total - 1), 0)

    def const_map(c, t):
        return (0, 0)

    flops = int(b * (6 * (c_ans + c_ent) + 14 * n_prop + 12))
    transcendentals = int(b * (c_ans + c_ent + n_prop))
    bytes_accessed = int(ans_pred.size * ans_pred.dtype.itemsize
                         + prop_pred.size * prop_pred.dtype.itemsize
                         + prop_true.size * prop_true.dtype.itemsize
                         + entity_pred.size * entity_pred.dtype.itemsize
                         + sidecar.size * 4
                         + 4 * n_prop + 12 + num_cores * _OUT_LANES * 4)

    kernel = functools.partial(_muti_task_loss_kernel,
                               total_b=b, tile_b=tb,
                               tiles_per_core=tiles_per_core,
                               needs_mask=needs_mask)

    out = pl.pallas_call(
        kernel,
        out_shape=jax.ShapeDtypeStruct((1, num_cores * _OUT_LANES), jnp.float32),
        grid=(num_cores, tiles_per_core),
        in_specs=[
            pl.BlockSpec((tb, c_ans), row_map),       # ans_pred (native dtype)
            pl.BlockSpec((tb, n_prop), row_map),      # prop_pred (native dtype)
            pl.BlockSpec((tb, n_prop), row_map),      # prop_true (native dtype)
            pl.BlockSpec((tb, c_ent), row_map),       # entity_pred (native dtype)
            pl.BlockSpec((tb, 3), row_map),           # packed sidecar
            pl.BlockSpec((1, n_prop), const_map),     # alpha (resident)
            pl.BlockSpec((1, 3), const_map),          # softmaxed loss weights
        ],
        out_specs=pl.BlockSpec((1, _OUT_LANES), lambda c, t: (0, c)),
        scratch_shapes=[pltpu.VMEM((1, 1), jnp.float32)],
        compiler_params=pltpu.CompilerParams(
            dimension_semantics=("parallel", "arbitrary"),
            vmem_limit_bytes=_VMEM_LIMIT_BYTES),
        cost_estimate=pl.CostEstimate(flops=flops,
                                      transcendentals=transcendentals,
                                      bytes_accessed=bytes_accessed),
    )(ans_pred, prop_pred, prop_true, entity_pred, sidecar, alpha2, w)

    # Per-core partial sums live in lane 0 of each (1,128) block.
    partials = out.reshape(num_cores, _OUT_LANES)[:, 0]
    total = jnp.sum(partials) / b

    # PyTorch returns shape (1,) with efficiency, a 0-d scalar without.
    return total.reshape(1) if had_efficiency else total.reshape(())


def _reference(ans_true, ans_pred, prop_true, prop_pred,
               entity_true, entity_pred, efficiency, loss_weight):
    """Pure-JAX reference matching the PyTorch module (use_efficiency=True)."""
    b = ans_pred.shape[0]
    eff = efficiency.astype(jnp.float32)

    def ce(pred, true):
        pred = pred.astype(jnp.float32)
        lse = jax.nn.logsumexp(pred, axis=-1)
        tl = jnp.take_along_axis(pred, true[:, None].astype(jnp.int32),
                                 axis=-1)[:, 0]
        return lse - tl

    loss1 = jnp.sum(ce(ans_pred, ans_true) * eff) / b
    loss3 = jnp.sum(ce(entity_pred, entity_true) * eff) / b

    p = prop_pred.astype(jnp.float32)
    labels = prop_true.astype(jnp.float32)
    alpha = jnp.asarray(_PROP_ALPHA, jnp.float32)[None, :]
    pt = (labels - (1.0 - p)) * (2.0 * labels - 1.0)
    alpha_t = (labels - (1.0 - alpha)) * (2.0 * labels - 1.0)
    fl = -alpha_t * (1.0 - pt) ** 2 * jnp.log(pt)
    loss2 = jnp.sum(fl * eff[:, None]) / b

    w = jax.nn.softmax(loss_weight.astype(jnp.float32))
    return (w[0] * loss1 + w[1] * loss2 + w[2] * loss3).reshape(1)


def _make_inputs(key, b, c_ans, c_ent, n_prop):
    ks = jax.random.split(key, 7)
    ans_pred = jax.random.normal(ks[0], (b, c_ans), dtype=jnp.float32)
    ans_true = jax.random.randint(ks[1], (b,), 0, c_ans, dtype=jnp.int32)
    # multi-label focal loss expects probabilities in (0, 1)
    prop_pred = jax.nn.sigmoid(jax.random.normal(ks[2], (b, n_prop),
                                                 dtype=jnp.float32))
    prop_true = jax.random.randint(ks[3], (b, n_prop), 0, 2, dtype=jnp.int32)
    entity_pred = jax.random.normal(ks[4], (b, c_ent), dtype=jnp.float32)
    entity_true = jax.random.randint(ks[5], (b,), 0, c_ent, dtype=jnp.int32)
    efficiency = jax.random.uniform(ks[6], (b,), dtype=jnp.float32)
    return (ans_true, ans_pred, prop_true, prop_pred,
            entity_true, entity_pred, efficiency)


if __name__ == "__main__":
    key = jax.random.PRNGKey(0)
    k1, k2 = jax.random.split(key)
    C_ANS, C_ENT = 32, 24
    N_PROP = len(_PROP_ALPHA)     # 19
    loss_weight = jnp.ones((3,), jnp.float32)

    # Case 1: small batch -> single tile, single core, no masking.
    inputs1 = _make_inputs(k1, 12, C_ANS, C_ENT, N_PROP)
    out1 = muti_task_loss(*inputs1, loss_weight=loss_weight)
    out1 = jax.block_until_ready(out1)
    ref1 = _reference(*inputs1, loss_weight=loss_weight)
    assert out1.shape == (1,), out1.shape
    assert jnp.allclose(out1, ref1, atol=1e-4, rtol=1e-4), (out1, ref1)

    # Case 2: force a small tile to exercise the multi-tile reduction,
    # the 2-way core-parallel split and the last-tile row masking.
    inputs2 = _make_inputs(k2, 200, C_ANS, C_ENT, N_PROP)
    out2 = muti_task_loss(*inputs2, loss_weight=loss_weight, max_tile_rows=64)
    out2 = jax.block_until_ready(out2)
    ref2 = _reference(*inputs2, loss_weight=loss_weight)
    assert out2.shape == (1,), out2.shape
    assert jnp.allclose(out2, ref2, atol=1e-4, rtol=1e-4), (out2, ref2)

    print("KERNEL_OK")
</pallas_src>

<mosaic_0001>
module attributes {stable_mosaic.version = 11 : i64} {
  func.func @_muti_task_loss_kernel(%arg0: i32, %arg1: i32, %arg2: memref<12x32xf32, #tpu.memory_space<vmem>>, %arg3: memref<12x19xf32, #tpu.memory_space<vmem>>, %arg4: memref<12x19xi32, #tpu.memory_space<vmem>>, %arg5: memref<12x24xf32, #tpu.memory_space<vmem>>, %arg6: memref<12x3xf32, #tpu.memory_space<vmem>>, %arg7: memref<1x19xf32, #tpu.memory_space<vmem>>, %arg8: memref<1x3xf32, #tpu.memory_space<vmem>>, %arg9: memref<1x128xf32, #tpu.memory_space<vmem>>, %arg10: memref<1x1xf32, #tpu.memory_space<vmem>>) attributes {dimension_semantics = [#tpu.dimension_semantics<parallel>, #tpu.dimension_semantics<arbitrary>], iteration_bounds = array<i64: 1, 1>, scalar_prefetch = 0 : i64, scratch_operands = 1 : i64, tpu.core_type = #tpu.core_type<tc>, window_params = [{transform_indices = @transform_0, window_bounds = array<i64: 12, 32>}, {transform_indices = @transform_1, window_bounds = array<i64: 12, 19>}, {transform_indices = @transform_2, window_bounds = array<i64: 12, 19>}, {transform_indices = @transform_3, window_bounds = array<i64: 12, 24>}, {transform_indices = @transform_4, window_bounds = array<i64: 12, 3>}, {pipeline_mode = #tpu.pipeline_mode<synchronous>, transform_indices = @transform_5, window_bounds = array<i64: 1, 19>}, {pipeline_mode = #tpu.pipeline_mode<synchronous>, transform_indices = @transform_6, window_bounds = array<i64: 1, 3>}, {transform_indices = @transform_7, window_bounds = array<i64: 1, 128>}]} {
    %c0_i32 = arith.constant 0 : i32
    %0 = arith.cmpi eq, %arg1, %c0_i32 : i32
    %1 = arith.extui %0 : i1 to i32
    %c0_i32_0 = arith.constant 0 : i32
    %2 = arith.cmpi ne, %1, %c0_i32_0 : i32
    scf.if %2 {
      %cst_37 = arith.constant 0.000000e+00 : f32
      %97 = vector.broadcast %cst_37 : f32 to vector<1x1xf32>
      %c0_38 = arith.constant 0 : index
      %c0_39 = arith.constant 0 : index
      %98 = vector.load %arg10[%c0_38, %c0_39] : memref<1x1xf32, #tpu.memory_space<vmem>>, vector<1x1xf32>
      tpu.vector_store %arg10[%c0_38, %c0_39], %97 {strides = array<i32>} : memref<1x1xf32, #tpu.memory_space<vmem>>, vector<1x1xf32>,
    } else {
    }
    %c0 = arith.constant 0 : index
    %c0_1 = arith.constant 0 : index
    %3 = vector.load %arg6[%c0, %c0_1] : memref<12x3xf32, #tpu.memory_space<vmem>>, vector<12x3xf32>
    %4 = vector.extract_strided_slice %3 {offsets = [0, 2], sizes = [12, 1], strides = [1, 1]} : vector<12x3xf32> to vector<12x1xf32>
    %c0_2 = arith.constant 0 : index
    %c0_3 = arith.constant 0 : index
    %5 = vector.load %arg8[%c0_2, %c0_3] : memref<1x3xf32, #tpu.memory_space<vmem>>, vector<1x3xf32>
    %6 = vector.extract_strided_slice %5 {offsets = [0, 0], sizes = [1, 1], strides = [1, 1]} : vector<1x3xf32> to vector<1x1xf32>
    %7 = vector.extract_strided_slice %5 {offsets = [0, 1], sizes = [1, 1], strides = [1, 1]} : vector<1x3xf32> to vector<1x1xf32>
    %8 = vector.extract_strided_slice %5 {offsets = [0, 2], sizes = [1, 1], strides = [1, 1]} : vector<1x3xf32> to vector<1x1xf32>
    %c0_4 = arith.constant 0 : index
    %c0_5 = arith.constant 0 : index
    %9 = vector.load %arg2[%c0_4, %c0_5] : memref<12x32xf32, #tpu.memory_space<vmem>>, vector<12x32xf32>
    %10 = vector.extract_strided_slice %3 {offsets = [0, 0], sizes = [12, 1], strides = [1, 1]} : vector<12x3xf32> to vector<12x1xf32>
    %cst = arith.constant dense<0xFF800000> : vector<12xf32>
    %11 = vector.multi_reduction <maximumf>, %9, %cst [1] : vector<12x32xf32> to vector<12xf32>
    %12 = vector.shape_cast %11 : vector<12xf32> to vector<12x1xf32>
    %13 = vector.broadcast %12 : vector<12x1xf32> to vector<12x32xf32>
    %14 = arith.subf %9, %13 : vector<12x32xf32>
    %15 = math.exp %14 : vector<12x32xf32>
    %cst_6 = arith.constant dense<0.000000e+00> : vector<12xf32>
    %16 = vector.multi_reduction <add>, %15, %cst_6 [1] : vector<12x32xf32> to vector<12xf32>
    %17 = vector.shape_cast %16 : vector<12xf32> to vector<12x1xf32>
    %18 = math.log %17 : vector<12x1xf32>
    %19 = arith.addf %12, %18 : vector<12x1xf32>
    %20 = tpu.iota {dimensions = array<i32: 1>} : vector<12x32xi32>
    %21 = arith.fptosi %10 : vector<12x1xf32> to vector<12x1xi32>
    %22 = vector.broadcast %21 : vector<12x1xi32> to vector<12x32xi32>
    %23 = arith.cmpi eq, %20, %22 : vector<12x32xi32>
    %cst_7 = arith.constant 0.000000e+00 : f32
    %24 = vector.broadcast %cst_7 : f32 to vector<12x32xf32>
    %25 = arith.select %23, %9, %24 : vector<12x32xi1>, vector<12x32xf32>
    %cst_8 = arith.constant dense<0.000000e+00> : vector<12xf32>
    %26 = vector.multi_reduction <add>, %25, %cst_8 [1] : vector<12x32xf32> to vector<12xf32>
    %27 = vector.shape_cast %26 : vector<12xf32> to vector<12x1xf32>
    %28 = arith.subf %19, %27 : vector<12x1xf32>
    %c0_9 = arith.constant 0 : index
    %c0_10 = arith.constant 0 : index
    %29 = vector.load %arg5[%c0_9, %c0_10] : memref<12x24xf32, #tpu.memory_space<vmem>>, vector<12x24xf32>
    %30 = vector.extract_strided_slice %3 {offsets = [0, 1], sizes = [12, 1], strides = [1, 1]} : vector<12x3xf32> to vector<12x1xf32>
    %cst_11 = arith.constant dense<0xFF800000> : vector<12xf32>
    %31 = vector.multi_reduction <maximumf>, %29, %cst_11 [1] : vector<12x24xf32> to vector<12xf32>
    %32 = vector.shape_cast %31 : vector<12xf32> to vector<12x1xf32>
    %33 = vector.broadcast %32 : vector<12x1xf32> to vector<12x24xf32>
    %34 = arith.subf %29, %33 : vector<12x24xf32>
    %35 = math.exp %34 : vector<12x24xf32>
    %cst_12 = arith.constant dense<0.000000e+00> : vector<12xf32>
    %36 = vector.multi_reduction <add>, %35, %cst_12 [1] : vector<12x24xf32> to vector<12xf32>
    %37 = vector.shape_cast %36 : vector<12xf32> to vector<12x1xf32>
    %38 = math.log %37 : vector<12x1xf32>
    %39 = arith.addf %32, %38 : vector<12x1xf32>
    %40 = tpu.iota {dimensions = array<i32: 1>} : vector<12x24xi32>
    %41 = arith.fptosi %30 : vector<12x1xf32> to vector<12x1xi32>
    %42 = vector.broadcast %41 : vector<12x1xi32> to vector<12x24xi32>
    %43 = arith.cmpi eq, %40, %42 : vector<12x24xi32>
    %cst_13 = arith.constant 0.000000e+00 : f32
    %44 = vector.broadcast %cst_13 : f32 to vector<12x24xf32>
    %45 = arith.select %43, %29, %44 : vector<12x24xi1>, vector<12x24xf32>
    %cst_14 = arith.constant dense<0.000000e+00> : vector<12xf32>
    %46 = vector.multi_reduction <add>, %45, %cst_14 [1] : vector<12x24xf32> to vector<12xf32>
    %47 = vector.shape_cast %46 : vector<12xf32> to vector<12x1xf32>
    %48 = arith.subf %39, %47 : vector<12x1xf32>
    %c0_15 = arith.constant 0 : index
    %c0_16 = arith.constant 0 : index
    %49 = vector.load %arg3[%c0_15, %c0_16] : memref<12x19xf32, #tpu.memory_space<vmem>>, vector<12x19xf32>
    %c0_17 = arith.constant 0 : index
    %c0_18 = arith.constant 0 : index
    %50 = vector.load %arg4[%c0_17, %c0_18] : memref<12x19xi32, #tpu.memory_space<vmem>>, vector<12x19xi32>
    %51 = arith.sitofp %50 : vector<12x19xi32> to vector<12x19xf32>
    %c0_19 = arith.constant 0 : index
    %c0_20 = arith.constant 0 : index
    %52 = vector.load %arg7[%c0_19, %c0_20] : memref<1x19xf32, #tpu.memory_space<vmem>>, vector<1x19xf32>
    %cst_21 = arith.constant 1.000000e+00 : f32
    %53 = vector.broadcast %cst_21 : f32 to vector<12x19xf32>
    %54 = arith.subf %53, %49 : vector<12x19xf32>
    %55 = arith.subf %51, %54 : vector<12x19xf32>
    %cst_22 = arith.constant 2.000000e+00 : f32
    %56 = vector.broadcast %cst_22 : f32 to vector<12x19xf32>
    %57 = arith.mulf %56, %51 : vector<12x19xf32>
    %cst_23 = arith.constant 1.000000e+00 : f32
    %58 = vector.broadcast %cst_23 : f32 to vector<12x19xf32>
    %59 = arith.subf %57, %58 : vector<12x19xf32>
    %60 = arith.mulf %55, %59 : vector<12x19xf32>
    %cst_24 = arith.constant 1.000000e+00 : f32
    %61 = vector.broadcast %cst_24 : f32 to vector<1x19xf32>
    %62 = arith.subf %61, %52 : vector<1x19xf32>
    %63 = vector.broadcast %62 : vector<1x19xf32> to vector<12x19xf32>
    %64 = arith.subf %51, %63 : vector<12x19xf32>
    %cst_25 = arith.constant 2.000000e+00 : f32
    %65 = vector.broadcast %cst_25 : f32 to vector<12x19xf32>
    %66 = arith.mulf %65, %51 : vector<12x19xf32>
    %cst_26 = arith.constant 1.000000e+00 : f32
    %67 = vector.broadcast %cst_26 : f32 to vector<12x19xf32>
    %68 = arith.subf %66, %67 : vector<12x19xf32>
    %69 = arith.mulf %64, %68 : vector<12x19xf32>
    %cst_27 = arith.constant 1.000000e+00 : f32
    %70 = vector.broadcast %cst_27 : f32 to vector<12x19xf32>
    %71 = arith.subf %70, %60 : vector<12x19xf32>
    %cst_28 = arith.constant 0.000000e+00 : f32
    %72 = vector.broadcast %cst_28 : f32 to vector<12x19xf32>
    %73 = arith.subf %72, %69 : vector<12x19xf32>
    %74 = arith.mulf %71, %71 : vector<12x19xf32>
    %75 = arith.mulf %73, %74 : vector<12x19xf32>
    %76 = math.log %60 : vector<12x19xf32>
    %77 = arith.mulf %75, %76 : vector<12x19xf32>
    %cst_29 = arith.constant dense<0.000000e+00> : vector<12xf32>
    %78 = vector.multi_reduction <add>, %77, %cst_29 [1] : vector<12x19xf32> to vector<12xf32>
    %79 = vector.shape_cast %78 : vector<12xf32> to vector<12x1xf32>
    %80 = vector.broadcast %6 : vector<1x1xf32> to vector<12x1xf32>
    %81 = arith.mulf %80, %28 : vector<12x1xf32>
    %82 = vector.broadcast %7 : vector<1x1xf32> to vector<12x1xf32>
    %83 = arith.mulf %82, %79 : vector<12x1xf32>
    %84 = arith.addf %81, %83 : vector<12x1xf32>
    %85 = vector.broadcast %8 : vector<1x1xf32> to vector<12x1xf32>
    %86 = arith.mulf %85, %48 : vector<12x1xf32>
    %87 = arith.addf %84, %86 : vector<12x1xf32>
    %c0_30 = arith.constant 0 : index
    %c0_31 = arith.constant 0 : index
    %88 = vector.load %arg10[%c0_30, %c0_31] : memref<1x1xf32, #tpu.memory_space<vmem>>, vector<1x1xf32>
    %89 = arith.mulf %87, %4 : vector<12x1xf32>
    %cst_32 = arith.constant dense<0.000000e+00> : vector<1xf32>
    %90 = vector.multi_reduction <add>, %89, %cst_32 [0] : vector<12x1xf32> to vector<1xf32>
    %91 = vector.shape_cast %90 : vector<1xf32> to vector<1x1xf32>
    %92 = arith.addf %88, %91 : vector<1x1xf32>
    %c0_33 = arith.constant 0 : index
    %c0_34 = arith.constant 0 : index
    %93 = vector.load %arg10[%c0_33, %c0_34] : memref<1x1xf32, #tpu.memory_space<vmem>>, vector<1x1xf32>
    tpu.vector_store %arg10[%c0_33, %c0_34], %92 {strides = array<i32>} : memref<1x1xf32, #tpu.memory_space<vmem>>, vector<1x1xf32>,
    %c0_i32_35 = arith.constant 0 : i32
    %94 = arith.cmpi eq, %arg1, %c0_i32_35 : i32
    %95 = arith.extui %94 : i1 to i32
    %c0_i32_36 = arith.constant 0 : i32
    %96 = arith.cmpi ne, %95, %c0_i32_36 : i32
    scf.if %96 {
      %c0_37 = arith.constant 0 : index
      %c0_38 = arith.constant 0 : index
      %97 = vector.load %arg10[%c0_37, %c0_38] : memref<1x1xf32, #tpu.memory_space<vmem>>, vector<1x1xf32>
      %98 = vector.shape_cast %97 : vector<1x1xf32> to vector<1x1xf32>
      %99 = vector.broadcast %98 : vector<1x1xf32> to vector<1x128xf32>
      %c0_39 = arith.constant 0 : index
      %c0_40 = arith.constant 0 : index
      %100 = vector.load %arg9[%c0_39, %c0_40] : memref<1x128xf32, #tpu.memory_space<vmem>>, vector<1x128xf32>
      tpu.vector_store %arg9[%c0_39, %c0_40], %99 {strides = array<i32>} : memref<1x128xf32, #tpu.memory_space<vmem>>, vector<1x128xf32>,
    } else {
    }
    return
  }
  func.func @transform_0(%arg0: i32, %arg1: i32) -> (i32, i32) {
    %c1_i32 = arith.constant 1 : i32
    %0 = arith.muli %arg0, %c1_i32 : i32
    %1 = arith.addi %0, %arg1 : i32
    %c0_i32 = arith.constant 0 : i32
    %2 = arith.minsi %1, %c0_i32 : i32
    %c0_i32_0 = arith.constant 0 : i32
    %c0_i32_1 = arith.constant 0 : i32
    return %2, %c0_i32_0 : i32, i32
  }
  func.func @transform_1(%arg0: i32, %arg1: i32) -> (i32, i32) {
    %c1_i32 = arith.constant 1 : i32
    %0 = arith.muli %arg0, %c1_i32 : i32
    %1 = arith.addi %0, %arg1 : i32
    %c0_i32 = arith.constant 0 : i32
    %2 = arith.minsi %1, %c0_i32 : i32
    %c0_i32_0 = arith.constant 0 : i32
    %c0_i32_1 = arith.constant 0 : i32
    return %2, %c0_i32_0 : i32, i32
  }
  func.func @transform_2(%arg0: i32, %arg1: i32) -> (i32, i32) {
    %c1_i32 = arith.constant 1 : i32
    %0 = arith.muli %arg0, %c1_i32 : i32
    %1 = arith.addi %0, %arg1 : i32
    %c0_i32 = arith.constant 0 : i32
    %2 = arith.minsi %1, %c0_i32 : i32
    %c0_i32_0 = arith.constant 0 : i32
    %c0_i32_1 = arith.constant 0 : i32
    return %2, %c0_i32_0 : i32, i32
  }
  func.func @transform_3(%arg0: i32, %arg1: i32) -> (i32, i32) {
    %c1_i32 = arith.constant 1 : i32
    %0 = arith.muli %arg0, %c1_i32 : i32
    %1 = arith.addi %0, %arg1 : i32
    %c0_i32 = arith.constant 0 : i32
    %2 = arith.minsi %1, %c0_i32 : i32
    %c0_i32_0 = arith.constant 0 : i32
    %c0_i32_1 = arith.constant 0 : i32
    return %2, %c0_i32_0 : i32, i32
  }
  func.func @transform_4(%arg0: i32, %arg1: i32) -> (i32, i32) {
    %c1_i32 = arith.constant 1 : i32
    %0 = arith.muli %arg0, %c1_i32 : i32
    %1 = arith.addi %0, %arg1 : i32
    %c0_i32 = arith.constant 0 : i32
    %2 = arith.minsi %1, %c0_i32 : i32
    %c0_i32_0 = arith.constant 0 : i32
    %c0_i32_1 = arith.constant 0 : i32
    return %2, %c0_i32_0 : i32, i32
  }
  func.func @transform_5(%arg0: i32, %arg1: i32) -> (i32, i32) {
    %c0_i32 = arith.constant 0 : i32
    %c0_i32_0 = arith.constant 0 : i32
    %c0_i32_1 = arith.constant 0 : i32
    return %c0_i32, %c0_i32_0 : i32, i32
  }
  func.func @transform_6(%arg0: i32, %arg1: i32) -> (i32, i32) {
    %c0_i32 = arith.constant 0 : i32
    %c0_i32_0 = arith.constant 0 : i32
    %c0_i32_1 = arith.constant 0 : i32
    return %c0_i32, %c0_i32_0 : i32, i32
  }
  func.func @transform_7(%arg0: i32, %arg1: i32) -> (i32, i32) {
    %c0_i32 = arith.constant 0 : i32
    %c0_i32_0 = arith.constant 0 : i32
    return %c0_i32, %arg0 : i32, i32
  }
}

</mosaic_0001>

<bundles_post_ra>
// kernel: tpu_custom_call.1
= control target key start
LH: loop header
LB: loop body
LE: loop exit
PB: predicated region body
PF: predicated region fallthrough
CT: control target
= control target key end

     0   :  { %12 = vsyncpa [#allocation4], 0  ;;  %s698_s0 = inlined_call_operand.vmem [shape: f32[12,32], index: 0, kind: input, shape index: {}]   ;;  %s699_s1 = inlined_call_operand.hbm [shape: f32[12,19], index: 1, kind: input, shape index: {}]   ;;  %s700_s2 = inlined_call_operand.hbm [shape: s32[12,19], index: 2, kind: input, shape index: {}]   ;;  %s701_s3 = inlined_call_operand.hbm [shape: f32[12,24], index: 3, kind: input, shape index: {}]   ;;  %s702_s4 = inlined_call_operand.vmem [shape: f32[12,3], index: 4, kind: input, shape index: {}]   ;;  %s703_s5 = inlined_call_operand.vmem [shape: f32[1,19], index: 5, kind: input, shape index: {}]   ;;  %s704_s6 = inlined_call_operand.vmem [shape: f32[1,3], index: 6, kind: input, shape index: {}]   ;;  %s705_s7 = inlined_call_operand.hbm [shape: f32[1,128], index: 7, kind: output, shape index: {}]  }
   0x1   :  { %13 = vsyncpa [#allocation7], 0 }
   0x2   :  { %14 = vsyncpa [#allocation5], 0  ;;  %s549_s24 = smov [#allocation6]   ;;  %s550_s26 = smov [#allocation3]  }
   0x3   :  { %s58_s25 = sshll.u32 %s549_s24, 4  ;;  %s40_s27 = sshll.u32 %s550_s26, 4  ;;  %s59_s25 = int_to_ptr.vmem [resolvable:$true] %s58_s25  ;;  %s41_s27 = int_to_ptr.vmem [resolvable:$true] %s40_s27 }
   0x4   :  { %s471_s28 = scalar_lea.vmem %s59_s25, 256  ;;  %p476_p1 = scmp.lt.s32.totalorder %s59_s25, %s59_s25 }
   0x5   :  { %p472_p0 = scmp.ne.s32.totalorder %s59_s25, %s471_s28  ;;  %p477_p2 = scmp.lt.s32.totalorder %s471_s28, %s471_s28 }
   0x7   :  { %p478_p3 = por %p477_p2, %p476_p1 }
   0x9   :  { %p479_p4 = pnand %p478_p3, %p472_p0 }
   0xb   :  { %482 = shalt.err (!%p479_p4)
}
   0xc   :  { %s551_s29 = smov 128   ;;  %s552_s30 = smov 8  }
   0xd   :  { %64 = dma.hbm_to_vmem [thread:$0]  %s700_s2, 256, %s59_s25, [#allocation7], %s551_s29, %s551_s29, %s552_s30  }
   0xe   :  { %s491_s10 = scalar_lea.vmem %s41_s27, 256  ;;  %p496_p6 = scmp.lt.s32.totalorder %s41_s27, %s41_s27 }
   0xf   :  { %p492_p5 = scmp.ne.s32.totalorder %s41_s27, %s491_s10  ;;  %p497_p7 = scmp.lt.s32.totalorder %s491_s10, %s491_s10 }
  0x11   :  { %p498_p8 = por %p497_p7, %p496_p6 }
  0x13   :  { %p499_p9 = pnand %p498_p8, %p492_p5 }
  0x15   :  { %502 = shalt.err (!%p499_p9)
}
  0x16   :  { %46 = dma.hbm_to_vmem [thread:$0]  %s699_s1, 256, %s41_s27, [#allocation4], %s551_s29, %s551_s29, %s552_s30  }
  0x17   :  { %s553_s13 = smov [#allocation8]  }
  0x18   :  { %s76_s14 = sshll.u32 %s553_s13, 4  ;;  %s77_s14 = int_to_ptr.vmem [resolvable:$true] %s76_s14 }
  0x19   :  { %s511_s15 = scalar_lea.vmem %s77_s14, 256  ;;  %p516_p11 = scmp.lt.s32.totalorder %s77_s14, %s77_s14 }
  0x1a   :  { %p512_p10 = scmp.ne.s32.totalorder %s77_s14, %s511_s15  ;;  %p517_p12 = scmp.lt.s32.totalorder %s511_s15, %s511_s15 }
  0x1c   :  { %p518_p13 = por %p517_p12, %p516_p11 }
  0x1e   :  { %p519_p0 = pnand %p518_p13, %p512_p10 }
  0x20   :  { %522 = shalt.err (!%p519_p0)
}
  0x21   :  { %82 = dma.hbm_to_vmem [thread:$0]  %s701_s3, 256, %s77_s14, [#allocation7], %s551_s29, %s551_s29, %s552_s30  }
  0x22   :  { %543 = dma.done.wait [#allocation4], 256  }
  0x23   :  { %544 = vsyncadd [#allocation4], 4294967040 }
  0x24   :  { %545 = dma.done.wait [#allocation7], 512  }
  0x25   :  { %546 = vsyncadd [#allocation7], 4294966784  ;;  %v554_v0 = vmov 1   ;;  %v555_v1 = vmov 0   ;;  %vm223_vm0 = vcmask 195584   ;;  %v221_v2 = vld [vmem:[#allocation8] sm:$0xff]  ;;  %v199_v19 = vlaneseq }
  0x26   :  { %440 = vset.pattern.permute.xlu1 %v554_v0  ;;  %441 = vset.pattern.permute.xlu0 %v555_v1  ;;  %v612_v3 = vld [vmem:[%s702_s4] sm:$0xff]  ;;  %v614_v4 = vld [vmem:[#allocation8 + $0x8] sm:$0xf]  ;;  %vm227_vm1 = vcmask 191488   ;;  %v224_v5 = vsel %vm223_vm0, %v221_v2, -inf  ;;  %vm173_vm2 = vcmask 261120  }
  0x27   :  { %v425_v6 = vtrunc.f32 %v612_v3  ;;  %v621_v7 = vld [vmem:[%s702_s4 + $0x8] sm:$0xf]  ;;  %225 = vmax.xlane.f32.xlu0 %v224_v5  ;;  %v228_v10 = vsel %vm227_vm1, %v614_v4, -inf  ;;  %v632_v12 = vld [vmem:[%s698_s0] sm:$0xff]  ;;  %vm177_vm3 = vcmask 257024   ;;  %v643_v22 = vshrl.u32 %v199_v19, 7 }
  0x28   :  { %v427_v8 = vtrunc.f32 %v621_v7  ;;  %v174_v13 = vsel %vm173_vm2, %v632_v12, -inf  ;;  %v639_v14 = vld [vmem:[%s698_s0 + $0x8] sm:$0xf]  ;;  %v270_v16 = vld [vmem:[#allocation6 + $0x8] sm:$0xf]  ;;  %v651_v36 = vand.u32 127, %v199_v19 }
  0x29   :  { %v624_v9 = vcvt.f32.s32 %v425_v6  ;;  %v178_v15 = vsel %vm177_vm3, %v639_v14, -inf  ;;  %v272_v17 = vcvt.s32.f32 %v270_v16  ;;  %v268_v18 = vld [vmem:[#allocation3 + $0x8] sm:$0xf]  ;;  %v273_v25 = vld [vmem:[%s703_s5] sm:$0x1]  ;;  %v288_v28 = vsub.s32 0, %v643_v22 }
  0x2a   :  { %v428_v11 = vcvt.f32.s32 %v427_v8  ;;  %v275_v20 = vsub.f32 1.0, %v268_v18  ;;  %v284_v27 = vsub.f32 1.0, %v273_v25  ;;  %vm313_vm5 = vcmask 150528   ;;  %v269_v54 = vld [vmem:[#allocation6] sm:$0xff]  ;;  %v267_v57 = vld [vmem:[#allocation3] sm:$0xff]  ;;  %s556_s24 = smov 127  }
  0x2b   :  { %250 = vperm.xlu1 %440, %v624_v9   ;;  %229 = vmax.xlane.f32.xlu0 %v228_v10  ;;  %v279_v21 = vmul.f32 2.0, %v272_v17  ;;  %v271_v56 = vcvt.s32.f32 %v269_v54  ;;  %v274_v58 = vsub.f32 1.0, %v267_v57  ;;  %vm309_vm8 = vcmask 154624   ;;  %v424_v25 = vld [vmem:[%s704_s6] ss:$0 sm:$0xff]  ;;  %s557_s6 = smov 126  }
  0x2c   :  { %v277_v23 = vsub.f32 %v272_v17, %v275_v20  ;;  %v289_v29 = vrot.slane %v284_v27, %v288_v28  ;;  %vm166_vm10 = vcmask 0   ;;  %vm360_vm11 = vcmask 7168   ;;  %s559_s25 = smov [#allocation9]  }
  0x2d   :  { %v423_v24 = vadd.f32 -1.0, %v279_v21  ;;  %v278_v59 = vmul.f32 2.0, %v271_v56  ;;  %v276_v63 = vsub.f32 %v271_v56, %v274_v58  ;;  %vm362_vm12 = vcmask 3072   ;;  %s394_s26 = sshll.u32 %s559_s25, 4  ;;  %s395_s26 = int_to_ptr.vmem [resolvable:$true] %s394_s26 }
  0x2e   :  { %v292_v30 = vsub.f32 %v272_v17, %v289_v29  ;;  %v291_v8 = vsub.f32 %v271_v56, %v289_v29  ;;  %s523_s27 = scalar_lea.vmem %s395_s26, 16  ;;  %s527_s28 = scalar_lea.vmem %s395_s26, 32 }
  0x2f   :  { %253 = vperm.xlu1 %440, %v428_v11   ;;  %175 = vmax.xlane.f32.xlu0 %v174_v13  ;;  %v283_v26 = vmul.f32 %v423_v24, %v277_v23  ;;  %v422_v0 = vadd.f32 -1.0, %v278_v59  ;;  %p524_p1 = scmp.ne.s32.totalorder %s395_s26, %s523_s27  ;;  %p528_p2 = scmp.lt.s32.totalorder %s395_s26, %s395_s26 }
  0x30   :  { %v294_v31 = vmul.f32 %v423_v24, %v292_v30  ;;  %p529_p3 = scmp.lt.s32.totalorder %s527_s28, %s523_s27 }
  0x31   :  { %443 = vlog2.f32 %v283_v26  ;;  %v296_v32 = vsub.f32 1.0, %v283_v26  ;;  %v282_v6 = vmul.f32 %v422_v0, %v276_v63  ;;  %v293_v13 = vmul.f32 %v422_v0, %v291_v8 }
  0x32   :  { %v298_v33 = vsub.f32 0.0, %v294_v31  ;;  %p530_p4 = por %p529_p3, %p528_p2 }
  0x33   :  { %442 = vset.pattern.permute.xlu1 %v555_v1  ;;  %v300_v34 = vmul.f32 %v296_v32, %v296_v32 }
  0x34   :  { %p531_p5 = pnand %p530_p4, %p524_p1 }
  0x35   :  { %v302_v37 = vmul.f32 %v300_v34, %v298_v33 }
  0x3e   :  { %v444_v35 = vpop.eup %443 }
  0x3f   :  { %v306_v38 = vmul.f32 0.6931472, %v444_v35 }
  0x41   :  { %v308_v40 = vmul.f32 %v306_v38, %v302_v37 }
  0x43   :  { %v314_v43 = vsel %vm313_vm5, %v308_v40, 0.0 }
  0x53   :  { %179 = vmax.xlane.f32.xlu1 %v178_v15  ;;  %v295_v15 = vsub.f32 1.0, %v282_v6 }
  0x55   :  { %v299_v16 = vmul.f32 %v295_v15, %v295_v15 }
  0x64   :  { %207 = vperm.xlu1 %442, %v428_v11  }
  0xa6   :  { %v251_v39 = vpop.permute.xlu1 %250 }
  0xa7   :  { %vm255_vm4 = vcmp.eq.s32.totalorder %v651_v36, %v251_v39 }
  0xa8   :  { %v257_v41 = vsel %vm255_vm4, %v221_v2, 0.0 }
  0xa9   :  { %v259_v42 = vsel %vm223_vm0, %v257_v41, 0.0 }
  0xaa   :  { %260 = vadd.xlane.f32.xlu1 %v259_v42  ;;  %v254_v55 = vpop.permute.xlu1 %253 }
  0xab   :  { %vm256_vm7 = vcmp.eq.s32.totalorder %v651_v36, %v254_v55 }
  0xae   :  { %315 = vadd.xlane.f32.xlu1 %v314_v43 }
  0xb0   :  { %v655_v44 = vpop.xlane.xlu0 %225 }
  0xb1   :  { %v231_v45 = vsub.f32 %v221_v2, %v655_v44 }
  0xb3   :  { %v233_v46 = vmul.f32 1.442695, %v231_v45 }
  0xb4   :  { %v658_v47 = vpop.xlane.xlu0 %229 }
  0xb5   :  { %445 = vpow2.f32 %v233_v46  ;;  %v232_v48 = vsub.f32 %v614_v4, %v658_v47  ;;  %v558_v46 = vmov 0.0  }
  0xb6   :  { %167 = vst.msk [vmem:[#allocation2] sm:$0x1] %vm166_vm10, %v558_v46 }
  0xb7   :  { %v235_v49 = vmul.f32 1.442695, %v232_v48 }
  0xb8   :  { %v176_v29 = vpop.xlane.xlu0 %175 }
  0xb9   :  { %447 = vpow2.f32 %v235_v49 }
  0xc2   :  { %v446_v50 = vpop.eup %445 }
  0xc3   :  { %v237_v51 = vsel %vm223_vm0, %v446_v50, 0.0 }
  0xc4   :  { %238 = vadd.xlane.f32.xlu0 %v237_v51 }
  0xc6   :  { %v448_v52 = vpop.eup %447 }
  0xc7   :  { %v240_v53 = vsel %vm227_vm1, %v448_v52, 0.0 }
  0xc8   :  { %241 = vadd.xlane.f32.xlu0 %v240_v53 }
  0xdc   :  { %v664_v60 = vpop.xlane.xlu1 %179 }
  0xdd   :  { %v182_v61 = vsub.f32 %v639_v14, %v664_v60 }
  0xde   :  { %204 = vperm.xlu0 %441, %v624_v9   ;;  %v297_v9 = vsub.f32 0.0, %v293_v13 }
  0xdf   :  { %v185_v62 = vmul.f32 1.442695, %v182_v61 }
  0xe0   :  { %v208_v1 = vpop.permute.xlu1 %207  ;;  %v301_v18 = vmul.f32 %v299_v16, %v297_v9 }
  0xe1   :  { %449 = vpow2.f32 %v185_v62  ;;  %vm210_vm6 = vcmp.eq.s32.totalorder %v651_v36, %v208_v1 }
  0xe2   :  { %v212_v2 = vsel %vm210_vm6, %v639_v14, 0.0  ;;  %451 = vlog2.f32 %v282_v6  ;;  %v258_v14 = vsel %vm256_vm7, %v614_v4, 0.0  ;;  %v181_v4 = vsub.f32 %v632_v12, %v176_v29 }
  0xe3   :  { %v216_v5 = vsel %vm177_vm3, %v212_v2, 0.0  ;;  %v262_v21 = vsel %vm227_vm1, %v258_v14, 0.0 }
  0xe4   :  { %217 = vadd.xlane.f32.xlu1 %v216_v5  ;;  %v183_v30 = vmul.f32 1.442695, %v181_v4 }
  0xee   :  { %v450_v10 = vpop.eup %449 }
  0xef   :  { %v190_v11 = vsel %vm177_vm3, %v450_v10, 0.0  ;;  %v452_v17 = vpop.eup %451 }
  0xf0   :  { %191 = vadd.xlane.f32.xlu1 %v190_v11  ;;  %v304_v19 = vmul.f32 0.6931472, %v452_v17 }
  0xf2   :  { %v307_v20 = vmul.f32 %v304_v19, %v301_v18 }
  0xf4   :  { %v310_v23 = vsel %vm309_vm8, %v307_v20, 0.0 }
  0xfd   :  { %263 = vadd.xlane.f32.xlu0 %v262_v21 }
 0x101   :  { %311 = vadd.xlane.f32.xlu0 %v310_v23 }
 0x133   :  { %v261_v24 = vpop.xlane.xlu1 %260 }
 0x137   :  { %v316_v26 = vpop.xlane.xlu1 %315 }
 0x138   :  { %v326_v27 = vmul.f32 %v424_v25, %v316_v26 }
 0x13a   :  { %331 = vrot.lane.b32.xlu1 %v326_v27, %s556_s24 }
 0x14d   :  { %v239_v31 = vpop.xlane.xlu0 %238 }
 0x14e   :  { %453 = vlog2.f32 %v239_v31 }
 0x14f   :  { %455 = vpow2.f32 %v183_v30 }
 0x151   :  { %v242_v32 = vpop.xlane.xlu0 %241 }
 0x152   :  { %457 = vlog2.f32 %v242_v32 }
 0x159   :  { %v205_v33 = vpop.permute.xlu0 %204 }
 0x15a   :  { %vm209_vm9 = vcmp.eq.s32.totalorder %v651_v36, %v205_v33 }
 0x15b   :  { %v454_v34 = vpop.eup %453  ;;  %v211_v35 = vsel %vm209_vm9, %v632_v12, 0.0 }
 0x15c   :  { %v244_v37 = vmul.f32 0.6931472, %v454_v34  ;;  %v213_v38 = vsel %vm173_vm2, %v211_v35, 0.0  ;;  %v456_v39 = vpop.eup %455 }
 0x15d   :  { %214 = vadd.xlane.f32.xlu0 %v213_v38  ;;  %v187_v41 = vsel %vm173_vm2, %v456_v39, 0.0 }
 0x15e   :  { %v247_v40 = vadd.f32 %v244_v37, %v655_v44 }
 0x15f   :  { %v458_v36 = vpop.eup %457 }
 0x160   :  { %v265_v42 = vsub.f32 %v247_v40, %v261_v24  ;;  %v246_v45 = vmul.f32 0.6931472, %v458_v36  ;;  %v349_v24 = vld [vmem:[#allocation2] sm:$0x1] }
 0x161   :  { %188 = vadd.xlane.f32.xlu0 %v187_v41 }
 0x162   :  { %v337_v43 = vmul.f32 %v424_v25, %v265_v42  ;;  %v248_v48 = vadd.f32 %v246_v45, %v658_v47 }
 0x164   :  { %341 = vrot.lane.b32.xlu1 %v337_v43, %s557_s6 }
 0x168   :  { %352 = vrot.lane.b32.xlu1 %v612_v3, %s557_s6 }
 0x16d   :  { %v218_v3 = vpop.xlane.xlu1 %217 }
 0x179   :  { %v192_v52 = vpop.xlane.xlu1 %191 }
 0x17a   :  { %459 = vlog2.f32 %v192_v52 }
 0x186   :  { %v264_v12 = vpop.xlane.xlu0 %263 }
 0x187   :  { %v266_v49 = vsub.f32 %v248_v48, %v264_v12  ;;  %v460_v55 = vpop.eup %459 }
 0x188   :  { %v196_v56 = vmul.f32 0.6931472, %v460_v55 }
 0x189   :  { %v338_v51 = vmul.f32 %v424_v25, %v266_v49 }
 0x18a   :  { %v312_v44 = vpop.xlane.xlu0 %311  ;;  %v198_v47 = vadd.f32 %v196_v56, %v664_v60 }
 0x18b   :  { %v325_v50 = vmul.f32 %v424_v25, %v312_v44 }
 0x18c   :  { %v220_v63 = vsub.f32 %v198_v47, %v218_v3 }
 0x18d   :  { %329 = vrot.lane.b32.xlu0 %v325_v50, %s556_s24 }
 0x18e   :  { %v324_v5 = vmul.f32 %v424_v25, %v220_v63 }
 0x191   :  { %343 = vrot.lane.b32.xlu0 %v338_v51, %s557_s6 }
 0x195   :  { %354 = vrot.lane.b32.xlu0 %v621_v7, %s557_s6 }
 0x1ac   :  { %v332_v59 = vpop.permute.xlu1 %331 }
 0x1ad   :  { %v336_v11 = vadd.f32 %v332_v59, %v324_v5 }
 0x1d6   :  { %v342_v0 = vpop.permute.xlu1 %341 }
 0x1da   :  { %v353_v10 = vpop.permute.xlu1 %352 }
 0x1e6   :  { %v215_v53 = vpop.xlane.xlu0 %214 }
 0x1ea   :  { %v189_v54 = vpop.xlane.xlu0 %188 }
 0x1eb   :  { %461 = vlog2.f32 %v189_v54 }
 0x1f8   :  { %v462_v57 = vpop.eup %461 }
 0x1f9   :  { %v194_v58 = vmul.f32 0.6931472, %v462_v57 }
 0x1fb   :  { %v197_v61 = vadd.f32 %v194_v58, %v176_v29 }
 0x1fd   :  { %v219_v62 = vsub.f32 %v197_v61, %v215_v53 }
 0x1ff   :  { %v323_v1 = vmul.f32 %v424_v25, %v219_v62  ;;  %v330_v2 = vpop.permute.xlu0 %329 }
 0x201   :  { %v335_v7 = vadd.f32 %v330_v2, %v323_v1 }
 0x203   :  { %v344_v6 = vpop.permute.xlu0 %343  ;;  %v347_v8 = vadd.f32 %v342_v0, %v335_v7 }
 0x204   :  { %v348_v13 = vadd.f32 %v344_v6, %v336_v11 }
 0x205   :  { %v358_v15 = vmul.f32 %v353_v10, %v347_v8 }
 0x207   :  { %v355_v9 = vpop.permute.xlu0 %354  ;;  %v361_v60 = vsel %vm360_vm11, %v358_v15, 0.0 }
 0x208   :  { %v359_v16 = vmul.f32 %v355_v9, %v348_v13 }
 0x20a   :  { %v363_v17 = vsel %vm362_vm12, %v359_v16, 0.0 }
 0x20b   :  { %v364_v18 = vadd.f32 %v363_v17, %v361_v60 }
 0x20d   :  { %v365_v19 = vrot.slane %v364_v18, 4 }
 0x20f   :  { %v366_v14 = vadd.f32 %v365_v19, %v364_v18 }
 0x211   :  { %v367_v20 = vrot.slane %v366_v14, 2 }
 0x213   :  { %v368_v21 = vadd.f32 %v367_v20, %v366_v14 }
 0x215   :  { %v369_v23 = vrot.slane %v368_v21, 1 }
 0x217   :  { %v370_v25 = vadd.f32 %v369_v23, %v368_v21 }
 0x219   :  { %v371_v26 = vadd.f32 %v370_v25, %v349_v24 }
 0x21b   :  { %373 = vst.msk [vmem:[#allocation2] sm:$0x1] %vm166_vm10, %v371_v26 }
 0x222   :  { %v377_v27 = vld [vmem:[#allocation2] sm:$0x1] }
 0x223   :  { %380 = vperm.xlu1 %442, %v377_v27  }
 0x29e   :  { %v381_v29 = vpop.permute.xlu1 %380 }
 0x29f   :  { %v386_v4 = vrot.slane %v381_v29, %v288_v28 }
 0x2a1   :  { %387 = vst [vmem:[#allocation9] sm:$0x1] %v386_v4 }
 0x2a2   :  { %534 = shalt.err (!%p531_p5)
}
 0x2a3   :  { %397 = dma.vmem_to_hbm [thread:$0]  %s395_s26, 16, %s705_s7, [#allocation5]  }
 0x2a4   :  { %547 = dma.done.wait [#allocation5], 16  }
 0x2a5   :  { %548 = vsyncadd [#allocation5], 4294967280 }
 0x2a6   :  { %401 = vsyncpa [#allocation4], 1 }
 0x2a7   :  { %402 = vsyncpa [#allocation7], 1 }
 0x2a8   :  { %403 = vsyncpa [#allocation5], 1 }

</bundles_post_ra>
